<compile_context>
chip_gen: v7x
topology: tpu7x:2x2x1
jax: 0.10.0
libtpu: 0.0.40
codegen_flags: <defaults>
</compile_context>

<pallas_src>
import functools

import jax
import jax.numpy as jnp
from jax.experimental import pallas as pl
from jax.experimental.pallas import tpu as pltpu


def _round_up(x, m):
    return ((x + m - 1) // m) * m


def _head_kernel(x_ref, w_ref, b_ref, out_ref, *, ns, ne):
    # x_ref  : (TB, H)      f32   — pooled last-token rows (contiguous slab)
    # w_ref  : (H, C_PAD)   bf16  — [ Ws | We | 0-pad ] fused classifier weight
    # b_ref  : (1, C_PAD)   f32   — [ bs | be | 0-pad ] fused bias
    # out_ref: (TB, C_PAD)  f32   — [ sent_probs | emo_probs | 0 ] lane-dense
    x = x_ref[...].astype(w_ref.dtype)           # free in-tile cast
    logits = jnp.dot(x, w_ref[...],
                     preferred_element_type=jnp.float32) + b_ref[...]

    lane = jax.lax.broadcasted_iota(jnp.int32, logits.shape, 1)
    mask_s = lane < ns
    mask_e = (lane >= ns) & (lane < ns + ne)
    valid = mask_s | mask_e

    neg_inf = jnp.float32(-jnp.inf)
    m_s = jnp.max(jnp.where(mask_s, logits, neg_inf), axis=-1, keepdims=True)
    m_e = jnp.max(jnp.where(mask_e, logits, neg_inf), axis=-1, keepdims=True)

    # Single exp pass: every lane is shifted by its own group's max; padded
    # lanes get -inf -> exp == 0 exactly, so padded output lanes stay 0.
    shift = jnp.where(mask_s, m_s, m_e)
    ex = jnp.exp(jnp.where(valid, logits - shift, neg_inf))

    den_s = jnp.sum(jnp.where(mask_s, ex, 0.0), axis=-1, keepdims=True)
    den_e = jnp.sum(jnp.where(mask_e, ex, 0.0), axis=-1, keepdims=True)
    inv = jnp.where(mask_s,
                    pl.reciprocal(den_s, approx=True),
                    pl.reciprocal(den_e, approx=True))

    out_ref[...] = ex * inv


def prepare_fused_head_params(ws, bs, we, be, *, weight_dtype=jnp.bfloat16):
    """Build fused, lane-padded classifier params ONCE (model-load time).

    ws: (H, NS), bs: (NS,), we: (H, NE), be: (NE,)  (PyTorch weights transposed).
    Returns (w_fused (H, C_PAD) weight_dtype, b_fused (1, C_PAD) f32, NS, NE).
    """
    H, NS = ws.shape
    NE = we.shape[1]
    assert NS > 0 and NE > 0, "both heads need at least one class"
    C = NS + NE
    C_PAD = _round_up(C, 128)

    w_fused = jnp.zeros((H, C_PAD), dtype=weight_dtype)
    w_fused = w_fused.at[:, :NS].set(ws.astype(weight_dtype))
    w_fused = w_fused.at[:, NS:C].set(we.astype(weight_dtype))
    b_fused = jnp.zeros((1, C_PAD), dtype=jnp.float32)
    b_fused = b_fused.at[:, :NS].set(bs.reshape(1, NS).astype(jnp.float32))
    b_fused = b_fused.at[:, NS:C].set(be.reshape(1, NE).astype(jnp.float32))
    return w_fused, b_fused, NS, NE


def sentiment_emotion_heads(pooled, w_fused, b_fused, ns, ne, *, block_b=256):
    """pooled (B, H) last-token rows -> (sentiment_probs, emotion_probs)."""
    B, H = pooled.shape
    C_PAD = w_fused.shape[1]

    # Batch tile: keep >= 2 grid steps when B > 8 so both v7x TensorCores get
    # work; tiny batches just use one full-extent block.
    if B <= 8:
        TB = B
    else:
        TB = min(block_b, _round_up(pl.cdiv(B, 2), 8))
    grid = (pl.cdiv(B, TB),)

    kernel = functools.partial(_head_kernel, ns=ns, ne=ne)

    out = pl.pallas_call(
        kernel,
        out_shape=jax.ShapeDtypeStruct((B, C_PAD), jnp.float32),
        grid_spec=pltpu.PrefetchScalarGridSpec(
            num_scalar_prefetch=0,
            grid=grid,
            in_specs=[
                # Contiguous pooled slab — one large DMA descriptor per step.
                pl.BlockSpec((TB, H), lambda i: (i, 0)),
                pl.BlockSpec((H, C_PAD), lambda i: (0, 0)),
                pl.BlockSpec((1, C_PAD), lambda i: (0, 0)),
            ],
            out_specs=pl.BlockSpec((TB, C_PAD), lambda i: (i, 0)),
        ),
        compiler_params=pltpu.CompilerParams(
            dimension_semantics=("parallel",)),
    )(pooled, w_fused, b_fused)

    return out[:, :ns], out[:, ns:ns + ne]


def synthetic_gpt_last_hidden(input_ids, attention_mask, embed_table):
    # TODO(synk): the GPT backbone (self.gpt(input_ids, attention_mask=...)) is an
    # external pretrained model with no in-script equivalent; it is replaced by a
    # deterministic embedding lookup modulated by the attention mask.
    h = embed_table[input_ids]                                   # (B, S, H)
    return h * attention_mask[..., None].astype(h.dtype)


def sentiment_emotion_forward(input_ids, attention_mask, embed_table,
                              w_fused, b_fused, ns, ne):
    last_hidden_state = synthetic_gpt_last_hidden(
        input_ids, attention_mask, embed_table)
    # Last-token pooling: contiguous (B, H) slice in the backbone's native
    # dtype — no full-(B,S,H) cast, no extra HBM pass.
    pooled = last_hidden_state[:, -1, :]
    return sentiment_emotion_heads(pooled, w_fused, b_fused, ns, ne)


if __name__ == "__main__":
    # Small shapes consistent with the module's forward.
    B, S, H = 2, 8, 32          # batch, sequence, gpt hidden_size
    NUM_SENTIMENTS = 3
    NUM_EMOTIONS = 6
    VOCAB = 50

    key = jax.random.PRNGKey(0)
    k_ids, k_emb, k_ws, k_bs, k_we, k_be = jax.random.split(key, 6)

    input_ids = jax.random.randint(k_ids, (B, S), 0, VOCAB, dtype=jnp.int32)
    attention_mask = jnp.ones((B, S), dtype=jnp.int32)

    # Deterministic parameter init (synthetic; no checkpoint loading).
    embed_table = jax.random.normal(k_emb, (VOCAB, H), dtype=jnp.float32) * 0.1
    # nn.Linear(hidden_size, num_classes): weight (C, H), bias (C,)
    ws_t = jax.random.normal(k_ws, (NUM_SENTIMENTS, H), dtype=jnp.float32) * 0.05
    bs = jax.random.normal(k_bs, (NUM_SENTIMENTS,), dtype=jnp.float32) * 0.05
    we_t = jax.random.normal(k_we, (NUM_EMOTIONS, H), dtype=jnp.float32) * 0.05
    be = jax.random.normal(k_be, (NUM_EMOTIONS,), dtype=jnp.float32) * 0.05

    # Kernel-friendly layout: (H, C) weights; fused/padded ONCE at load time.
    ws = ws_t.T
    we = we_t.T
    w_fused, b_fused, NS, NE = prepare_fused_head_params(ws, bs, we, be)

    sent_probs, emo_probs = sentiment_emotion_forward(
        input_ids, attention_mask, embed_table, w_fused, b_fused, NS, NE)
    jax.block_until_ready((sent_probs, emo_probs))

    assert sent_probs.shape == (B, NUM_SENTIMENTS)
    assert emo_probs.shape == (B, NUM_EMOTIONS)

    # Reference matching the kernel's numerics (bf16 weights/activation tile,
    # f32 accumulate, exact-division softmax).
    last_hidden_state = synthetic_gpt_last_hidden(
        input_ids, attention_mask, embed_table)
    pooled = last_hidden_state[:, -1, :]
    pooled_c = pooled.astype(jnp.bfloat16)
    s_logits = jnp.dot(pooled_c, ws.astype(jnp.bfloat16),
                       preferred_element_type=jnp.float32) + bs[None, :]
    e_logits = jnp.dot(pooled_c, we.astype(jnp.bfloat16),
                       preferred_element_type=jnp.float32) + be[None, :]
    ref_sent = jax.nn.softmax(s_logits, axis=1)
    ref_emo = jax.nn.softmax(e_logits, axis=1)
    # approx reciprocal contributes up to ~2.4e-4 relative error on the probs.
    assert jnp.allclose(sent_probs, ref_sent, atol=1e-3)
    assert jnp.allclose(emo_probs, ref_emo, atol=1e-3)

    # Fidelity to the original f32 module semantics (bf16 cast error only).
    ref_sent_f32 = jax.nn.softmax(pooled @ ws + bs[None, :], axis=1)
    ref_emo_f32 = jax.nn.softmax(pooled @ we + be[None, :], axis=1)
    assert jnp.allclose(sent_probs, ref_sent_f32, atol=1e-2)
    assert jnp.allclose(emo_probs, ref_emo_f32, atol=1e-2)

    assert jnp.allclose(jnp.sum(sent_probs, axis=1), 1.0, atol=2e-3)
    assert jnp.allclose(jnp.sum(emo_probs, axis=1), 1.0, atol=2e-3)

    print("KERNEL_OK")
</pallas_src>

<mosaic_0001>
module attributes {stable_mosaic.version = 11 : i64} {
  func.func @_head_kernel(%arg0: i32, %arg1: memref<2x32xf32, #tpu.memory_space<vmem>>, %arg2: memref<32x128xbf16, #tpu.memory_space<vmem>>, %arg3: memref<1x128xf32, #tpu.memory_space<vmem>>, %arg4: memref<2x128xf32, #tpu.memory_space<vmem>>) attributes {dimension_semantics = [#tpu.dimension_semantics<parallel>], iteration_bounds = array<i64: 1>, scalar_prefetch = 0 : i64, scratch_operands = 0 : i64, tpu.core_type = #tpu.core_type<tc>, window_params = [{transform_indices = @transform_0, window_bounds = array<i64: 2, 32>}, {pipeline_mode = #tpu.pipeline_mode<synchronous>, transform_indices = @transform_1, window_bounds = array<i64: 32, 128>}, {pipeline_mode = #tpu.pipeline_mode<synchronous>, transform_indices = @transform_2, window_bounds = array<i64: 1, 128>}, {transform_indices = @transform_3, window_bounds = array<i64: 2, 128>}]} {
    %c0 = arith.constant 0 : index
    %c0_0 = arith.constant 0 : index
    %0 = vector.load %arg1[%c0, %c0_0] : memref<2x32xf32, #tpu.memory_space<vmem>>, vector<2x32xf32>
    %1 = arith.truncf %0 : vector<2x32xf32> to vector<2x32xbf16>
    %c0_1 = arith.constant 0 : index
    %c0_2 = arith.constant 0 : index
    %2 = vector.load %arg2[%c0_1, %c0_2] : memref<32x128xbf16, #tpu.memory_space<vmem>>, vector<32x128xbf16>
    %cst = arith.constant dense<0.000000e+00> : vector<2x128xf32>
    %3 = tpu.matmul %1, %2, %cst {dimension_numbers = #tpu.dot_dimension_numbers<[1], [0], [0], [1], [0, 0, 1, 1], [], []>} : vector<2x32xbf16>, vector<32x128xbf16>, vector<2x128xf32> -> vector<2x128xf32>
    %c0_3 = arith.constant 0 : index
    %c0_4 = arith.constant 0 : index
    %4 = vector.load %arg3[%c0_3, %c0_4] : memref<1x128xf32, #tpu.memory_space<vmem>>, vector<1x128xf32>
    %5 = vector.broadcast %4 : vector<1x128xf32> to vector<2x128xf32>
    %6 = arith.addf %3, %5 : vector<2x128xf32>
    %7 = tpu.iota {dimensions = array<i32: 1>} : vector<2x128xi32>
    %c3_i32 = arith.constant 3 : i32
    %8 = vector.broadcast %c3_i32 : i32 to vector<2x128xi32>
    %9 = arith.cmpi slt, %7, %8 : vector<2x128xi32>
    %c3_i32_5 = arith.constant 3 : i32
    %10 = vector.broadcast %c3_i32_5 : i32 to vector<2x128xi32>
    %11 = arith.cmpi sge, %7, %10 : vector<2x128xi32>
    %c9_i32 = arith.constant 9 : i32
    %12 = vector.broadcast %c9_i32 : i32 to vector<2x128xi32>
    %13 = arith.cmpi slt, %7, %12 : vector<2x128xi32>
    %14 = arith.andi %11, %13 : vector<2x128xi1>
    %15 = arith.ori %9, %14 : vector<2x128xi1>
    %cst_6 = arith.constant 0xFF800000 : f32
    %16 = vector.broadcast %cst_6 : f32 to vector<2x128xf32>
    %17 = arith.select %9, %6, %16 : vector<2x128xi1>, vector<2x128xf32>
    %cst_7 = arith.constant dense<0xFF800000> : vector<2xf32>
    %18 = vector.multi_reduction <maximumf>, %17, %cst_7 [1] : vector<2x128xf32> to vector<2xf32>
    %19 = vector.shape_cast %18 : vector<2xf32> to vector<2x1xf32>
    %cst_8 = arith.constant 0xFF800000 : f32
    %20 = vector.broadcast %cst_8 : f32 to vector<2x128xf32>
    %21 = arith.select %14, %6, %20 : vector<2x128xi1>, vector<2x128xf32>
    %cst_9 = arith.constant dense<0xFF800000> : vector<2xf32>
    %22 = vector.multi_reduction <maximumf>, %21, %cst_9 [1] : vector<2x128xf32> to vector<2xf32>
    %23 = vector.shape_cast %22 : vector<2xf32> to vector<2x1xf32>
    %24 = vector.shape_cast %19 : vector<2x1xf32> to vector<2x1xf32>
    %25 = vector.broadcast %24 : vector<2x1xf32> to vector<2x128xf32>
    %26 = vector.shape_cast %23 : vector<2x1xf32> to vector<2x1xf32>
    %27 = vector.broadcast %26 : vector<2x1xf32> to vector<2x128xf32>
    %28 = arith.select %9, %25, %27 : vector<2x128xi1>, vector<2x128xf32>
    %29 = arith.subf %6, %28 : vector<2x128xf32>
    %cst_10 = arith.constant 0xFF800000 : f32
    %30 = vector.broadcast %cst_10 : f32 to vector<2x128xf32>
    %31 = arith.select %15, %29, %30 : vector<2x128xi1>, vector<2x128xf32>
    %32 = math.exp %31 : vector<2x128xf32>
    %cst_11 = arith.constant 0.000000e+00 : f32
    %33 = vector.broadcast %cst_11 : f32 to vector<2x128xf32>
    %34 = arith.select %9, %32, %33 : vector<2x128xi1>, vector<2x128xf32>
    %cst_12 = arith.constant dense<0.000000e+00> : vector<2xf32>
    %35 = vector.multi_reduction <add>, %34, %cst_12 [1] : vector<2x128xf32> to vector<2xf32>
    %36 = vector.shape_cast %35 : vector<2xf32> to vector<2x1xf32>
    %cst_13 = arith.constant 0.000000e+00 : f32
    %37 = vector.broadcast %cst_13 : f32 to vector<2x128xf32>
    %38 = arith.select %14, %32, %37 : vector<2x128xi1>, vector<2x128xf32>
    %cst_14 = arith.constant dense<0.000000e+00> : vector<2xf32>
    %39 = vector.multi_reduction <add>, %38, %cst_14 [1] : vector<2x128xf32> to vector<2xf32>
    %40 = vector.shape_cast %39 : vector<2xf32> to vector<2x1xf32>
    %41 = tpu.reciprocal %36 {approx = true} : vector<2x1xf32> -> vector<2x1xf32>
    %42 = tpu.reciprocal %40 {approx = true} : vector<2x1xf32> -> vector<2x1xf32>
    %43 = vector.shape_cast %41 : vector<2x1xf32> to vector<2x1xf32>
    %44 = vector.broadcast %43 : vector<2x1xf32> to vector<2x128xf32>
    %45 = vector.shape_cast %42 : vector<2x1xf32> to vector<2x1xf32>
    %46 = vector.broadcast %45 : vector<2x1xf32> to vector<2x128xf32>
    %47 = arith.select %9, %44, %46 : vector<2x128xi1>, vector<2x128xf32>
    %48 = arith.mulf %32, %47 : vector<2x128xf32>
    %c0_15 = arith.constant 0 : index
    %c0_16 = arith.constant 0 : index
    %49 = vector.load %arg4[%c0_15, %c0_16] : memref<2x128xf32, #tpu.memory_space<vmem>>, vector<2x128xf32>
    tpu.vector_store %arg4[%c0_15, %c0_16], %48 {strides = array<i32>} : memref<2x128xf32, #tpu.memory_space<vmem>>, vector<2x128xf32>,
    return
  }
  func.func @transform_0(%arg0: i32) -> (i32, i32) {
    %c0_i32 = arith.constant 0 : i32
    %c0_i32_0 = arith.constant 0 : i32
    return %arg0, %c0_i32 : i32, i32
  }
  func.func @transform_1(%arg0: i32) -> (i32, i32) {
    %c0_i32 = arith.constant 0 : i32
    %c0_i32_0 = arith.constant 0 : i32
    %c0_i32_1 = arith.constant 0 : i32
    return %c0_i32, %c0_i32_0 : i32, i32
  }
  func.func @transform_2(%arg0: i32) -> (i32, i32) {
    %c0_i32 = arith.constant 0 : i32
    %c0_i32_0 = arith.constant 0 : i32
    %c0_i32_1 = arith.constant 0 : i32
    return %c0_i32, %c0_i32_0 : i32, i32
  }
  func.func @transform_3(%arg0: i32) -> (i32, i32) {
    %c0_i32 = arith.constant 0 : i32
    %c0_i32_0 = arith.constant 0 : i32
    return %arg0, %c0_i32 : i32, i32
  }
}

</mosaic_0001>

<bundles_post_ra>
// kernel: tpu_custom_call.1
= control target key start
LH: loop header
LB: loop body
LE: loop exit
PB: predicated region body
PF: predicated region fallthrough
CT: control target
= control target key end

     0   :  { %8 = vsyncpa [#allocation3], 0  ;;  %s355_s0 = inlined_call_operand.hbm [shape: f32[2,32], index: 0, kind: input, shape index: {}]   ;;  %s356_s1 = inlined_call_operand.hbm [shape: bf16[32,128], index: 1, kind: input, shape index: {}]   ;;  %s357_s2 = inlined_call_operand.vmem [shape: f32[1,128], index: 2, kind: input, shape index: {}]   ;;  %s358_s3 = inlined_call_operand.hbm [shape: f32[2,128], index: 3, kind: output, shape index: {}]  }
   0x1   :  { %9 = vsyncpa [#allocation6], 0 }
   0x2   :  { %10 = vsyncpa [#allocation4], 0  ;;  %s263_s12 = smov [#allocation2]   ;;  %s264_s14 = smov [#allocation5]  }
   0x3   :  { %s17_s13 = sshll.u32 %s263_s12, 4  ;;  %s26_s15 = sshll.u32 %s264_s14, 4  ;;  %s18_s13 = int_to_ptr.vmem [resolvable:$true] %s17_s13  ;;  %s290_s15 = int_to_ptr.vmem [resolvable:$true] %s26_s15 }
   0x4   :  { %s191_s18 = scalar_lea.hbm %s355_s0, 32 }
   0x5   :  { %p192_p0 = scmp.ne.s32.totalorder %s355_s0, %s191_s18  ;;  %p195_p1 = scmp.lt.u32.totalorder %s191_s18, %s355_s0 }
   0x7   :  { %p197_p2 = pnand %p195_p1, %p192_p0 }
   0x9   :  { %200 = shalt.err (!%p197_p2)
}
   0xa   :  { %s201_s23 = scalar_lea.vmem %s18_s13, 32  ;;  %p206_p4 = scmp.lt.s32.totalorder %s18_s13, %s18_s13 }
   0xb   :  { %p202_p3 = scmp.ne.s32.totalorder %s18_s13, %s201_s23  ;;  %p207_p5 = scmp.lt.s32.totalorder %s201_s23, %s201_s23 }
   0xd   :  { %p208_p6 = por %p207_p5, %p206_p4 }
   0xf   :  { %p209_p7 = pnand %p208_p6, %p202_p3 }
  0x11   :  { %212 = shalt.err (!%p209_p7)
}
  0x12   :  { %20 = dma.hbm_to_vmem [thread:$0]  %s355_s0, 32, %s18_s13, [#allocation3]  }
  0x13   :  { %s213_s28 = scalar_lea.hbm %s356_s1, 256 }
  0x14   :  { %p214_p8 = scmp.ne.s32.totalorder %s356_s1, %s213_s28  ;;  %p217_p9 = scmp.lt.u32.totalorder %s213_s28, %s356_s1 }
  0x16   :  { %p219_p10 = pnand %p217_p9, %p214_p8 }
  0x18   :  { %222 = shalt.err (!%p219_p10)
}
  0x19   :  { %s223_s6 = scalar_lea.vmem %s290_s15, 256  ;;  %p228_p12 = scmp.lt.s32.totalorder %s290_s15, %s290_s15 }
  0x1a   :  { %p224_p11 = scmp.ne.s32.totalorder %s290_s15, %s223_s6  ;;  %p229_p13 = scmp.lt.s32.totalorder %s223_s6, %s223_s6 }
  0x1c   :  { %p230_p0 = por %p229_p13, %p228_p12 }
  0x1e   :  { %p231_p1 = pnand %p230_p0, %p224_p11 }
  0x20   :  { %234 = shalt.err (!%p231_p1)
}
  0x21   :  { %s265_s0 = smov 64   ;;  %s266_s7 = smov 4  }
  0x22   :  { %32 = dma.hbm_to_vmem [thread:$0]  %s356_s1, 256, %s290_s15, [#allocation6], %s265_s0, %s265_s0, %s266_s7  }
  0x23   :  { %257 = dma.done.wait [#allocation3], 32  }
  0x24   :  { %258 = vsyncadd [#allocation3], 4294967264 }
  0x25   :  { %259 = dma.done.wait [#allocation6], 256  }
  0x26   :  { %260 = vsyncadd [#allocation6], 4294967040  ;;  %v267_v0 = vmov 0.0   ;;  %vm268_vm0 = vmmov 0   ;;  %v183_v1 = vld [vmem:[#allocation5] sm:$0xff]   ;;  %v184_v2 = vld [vmem:[#allocation5 + $0x8] sm:$0xff]   ;;  %v111_v5 = vlaneseq }
  0x27   :  { %168 = vmatprep.subr.bf16.mxu0 %v267_v0  ;;  %172 = vmatprep.mubr.msk.bf16.mxu0 %vm268_vm0, %v267_v0  ;;  %v42_v3 = vld [vmem:[#allocation2] sm:$0x3]  ;;  %vm67_vm1 = vcmask 261120   ;;  %vm119_vm5 = vcmask 1041408  }
  0x28   :  { %169 = vmatpush3.bf16.msra.mxu0 %v183_v1  ;;  %v43_v4 = vpack.c.bf16 %v42_v3, %v42_v3  ;;  %v112_v6 = vand.u32 127, %v111_v5  ;;  %v161_v7 = vld [vmem:[%s357_s2] ss:$0 sm:$0xff]  ;;  %s269_s2 = smov [#allocation7]  }
  0x29   :  { %170 = vmatprep.subr.bf16.mxu0 %v267_v0  ;;  %s151_s11 = sshll.u32 %s269_s2, 4  ;;  %s152_s11 = int_to_ptr.vmem [resolvable:$true] %s151_s11 }
  0x2a   :  { %vm114_vm2 = vcmp.ge.s32.totalorder %v112_v6, 3  ;;  %vm115_vm3 = vcmp.lt.s32.totalorder %v112_v6, 9  ;;  %vm113_vm4 = vcmp.lt.s32.totalorder %v112_v6, 3  ;;  %s235_s12 = scalar_lea.vmem %s152_s11, 32  ;;  %p240_p3 = scmp.lt.s32.totalorder %s152_s11, %s152_s11 }
  0x2b   :  { %vm324_vm6 = vmand %vm114_vm2, %vm115_vm3  ;;  %p236_p2 = scmp.ne.s32.totalorder %s152_s11, %s235_s12  ;;  %p241_p4 = scmp.lt.s32.totalorder %s235_s12, %s235_s12 }
  0x2c   :  { %171 = vmatpush3.bf16.msra.mxu0 %v184_v2  ;;  %vm117_vm7 = vmor %vm113_vm4, %vm324_vm6 }
  0x2d   :  { %p242_p5 = por %p241_p4, %p240_p3 }
  0x2f   :  { %173 = vmatmul.mubr.msk.bf16.vlgmr.msra.gmra.mrb[0].mxu0 %vm67_vm1, %v43_v4  ;;  %p243_p6 = pnand %p242_p5, %p236_p2 }
 0x102   :  { %v105_v8 = vpop.f32.mrb[0].mxu0 }
 0x103   :  { %v106_v9 = vadd.f32 %v161_v7, %v105_v8  ;;  %v174_v10 = vpop.f32.mrb[1].mxu0 }
 0x104   :  { %v108_v11 = vpop.f32.mrb[2].mxu0 }
 0x105   :  { %v175_v13 = vpop.f32.mrb[3].mxu0  ;;  %v118_v14 = vsel %vm113_vm4, %v106_v9, -inf  ;;  %v123_v16 = vsel %vm324_vm6, %v106_v9, -inf }
 0x106   :  { %v120_v15 = vsel %vm119_vm5, %v118_v14, -inf  ;;  %v124_v17 = vsel %vm119_vm5, %v123_v16, -inf }
 0x107   :  { %121 = vmax.xlane.f32.xlu0 %v120_v15 }
 0x10b   :  { %125 = vmax.xlane.f32.xlu0 %v124_v17 }
 0x194   :  { %v122_v18 = vpop.xlane.xlu0 %121 }
 0x198   :  { %v126_v19 = vpop.xlane.xlu0 %125 }
 0x199   :  { %v127_v20 = vsel %vm113_vm4, %v122_v18, %v126_v19 }
 0x19a   :  { %v128_v21 = vsub.f32 %v106_v9, %v127_v20 }
 0x19c   :  { %v129_v22 = vsel %vm117_vm7, %v128_v21, -inf }
 0x19d   :  { %v130_v23 = vmul.f32 1.442695, %v129_v22 }
 0x19f   :  { %185 = vpow2.f32 %v130_v23 }
 0x1a9   :  { %v186_v24 = vpop.eup %185 }
 0x1aa   :  { %v132_v25 = vsel %vm113_vm4, %v186_v24, 0.0  ;;  %v136_v27 = vsel %vm324_vm6, %v186_v24, 0.0 }
 0x1ab   :  { %v133_v26 = vsel %vm119_vm5, %v132_v25, 0.0  ;;  %v137_v28 = vsel %vm119_vm5, %v136_v27, 0.0 }
 0x1ac   :  { %134 = vadd.xlane.f32.xlu1 %v133_v26 }
 0x1b0   :  { %138 = vadd.xlane.f32.xlu1 %v137_v28 }
 0x239   :  { %v135_v29 = vpop.xlane.xlu1 %134 }
 0x23a   :  { %187 = vrcp.f32 %v135_v29 }
 0x23d   :  { %v139_v30 = vpop.xlane.xlu1 %138 }
 0x23e   :  { %189 = vrcp.f32 %v139_v30 }
 0x244   :  { %v188_v31 = vpop.eup %187 }
 0x248   :  { %v190_v32 = vpop.eup %189 }
 0x249   :  { %v142_v33 = vsel %vm113_vm4, %v188_v31, %v190_v32 }
 0x24a   :  { %v143_v34 = vmul.f32 %v186_v24, %v142_v33 }
 0x24c   :  { %144 = vst [vmem:[#allocation7] sm:$0x3] %v143_v34 }
 0x24d   :  { %246 = shalt.err (!%p243_p6)
}
 0x24e   :  { %s247_s15 = scalar_lea.hbm %s358_s3, 32 }
 0x24f   :  { %p248_p7 = scmp.ne.s32.totalorder %s358_s3, %s247_s15  ;;  %p251_p8 = scmp.lt.u32.totalorder %s247_s15, %s358_s3 }
 0x251   :  { %p253_p9 = pnand %p251_p8, %p248_p7 }
 0x253   :  { %256 = shalt.err (!%p253_p9)
}
 0x254   :  { %154 = dma.vmem_to_hbm [thread:$0]  %s152_s11, 32, %s358_s3, [#allocation4]  }
 0x255   :  { %261 = dma.done.wait [#allocation4], 32  }
 0x256   :  { %262 = vsyncadd [#allocation4], 4294967264 }
 0x257   :  { %158 = vsyncpa [#allocation3], 1 }
 0x258   :  { %159 = vsyncpa [#allocation6], 1 }
 0x259   :  { %160 = vsyncpa [#allocation4], 1 }

</bundles_post_ra>
